<compile_context>
chip_gen: v5e
topology: v5e:2x2
jax: 0.10.0
libtpu: 0.0.40
codegen_flags: <defaults>
</compile_context>

<pallas_src>
import functools

import jax
import jax.numpy as jnp
from jax.experimental import pallas as pl
from jax.experimental.pallas import tpu as pltpu


def _round_up(x, m):
    return ((x + m - 1) // m) * m


# ---------------------------------------------------------------------------
# Small-problem fast path: one invocation, everything VMEM-resident, pure f32.
# ---------------------------------------------------------------------------
def _gcn_kernel_small(x_ref, adj_ref, theta_ref, out_ref):
    """x: (B, N, in)  adj: (N, N)  theta: (in, out)  out: (B, N, out)."""
    adj = adj_ref[...]
    theta = theta_ref[...]
    for b in range(x_ref.shape[0]):          # static unroll over the batch
        xw = jnp.dot(x_ref[b], theta, preferred_element_type=jnp.float32)
        h = jnp.dot(adj, xw, preferred_element_type=jnp.float32)
        out_ref[b] = jnp.maximum(h, 0.0).astype(out_ref.dtype)


def _gcn_small(x, adj, theta):
    B, N, _ = x.shape
    out_dim = theta.shape[1]
    return pl.pallas_call(
        _gcn_kernel_small,
        out_shape=jax.ShapeDtypeStruct((B, N, out_dim), x.dtype),
    )(x, adj, theta)


# ---------------------------------------------------------------------------
# Tiled path: row-parallel / K-arbitrary grid with an f32 VMEM accumulator.
# ---------------------------------------------------------------------------
def _gcn_kernel_tiled(adj_ref, v_ref, theta_ref, out_ref, acc_ref,
                      *, tk, n_batch, in_dim, out_pad, compute_dtype):
    """One (row-tile i, reduction-tile k) grid step.

    adj_ref:   (tm, tk)            f32 adjacency tile (cast to MXU dtype here)
    v_ref:     (n_pad_k, B*in)     lane-stacked features, fully VMEM resident
    theta_ref: (in, out_pad)       padded weight (out_pad multiple of 128)
    out_ref:   (tm, B*out_pad)     lane-dense output tile (written at last k)
    acc_ref:   (tm, B*in)          f32 accumulator (resident across k)
    """
    k = pl.program_id(1)

    @pl.when(k == 0)
    def _init():
        acc_ref[...] = jnp.zeros_like(acc_ref)

    # Neighborhood aggregation: acc += adj_tile @ v_tile.  adj arrives in f32
    # straight from HBM and is cast here (VPU cast is hidden under the DMA);
    # v is already in compute_dtype and VMEM resident -> just slice K rows.
    adj_t = adj_ref[...].astype(compute_dtype)
    off = pl.multiple_of(k * tk, 128)
    v_t = v_ref[pl.ds(off, tk), :]
    acc_ref[...] += jnp.dot(adj_t, v_t, preferred_element_type=jnp.float32)

    @pl.when(k == pl.num_programs(1) - 1)
    def _finalize():
        theta = theta_ref[...]
        for b in range(n_batch):             # static unroll over the batch
            a_b = acc_ref[:, b * in_dim:(b + 1) * in_dim].astype(theta.dtype)
            h = jnp.dot(a_b, theta, preferred_element_type=jnp.float32)
            # 128-aligned, lane-dense store (out_pad is a multiple of 128).
            out_ref[:, b * out_pad:(b + 1) * out_pad] = (
                jnp.maximum(h, 0.0).astype(out_ref.dtype))


def _gcn_tiled(x, adj, theta, *, tm, tk, compute_dtype, vmem_limit_bytes):
    B, N, in_dim = x.shape
    out_dim = theta.shape[1]
    w_in = B * in_dim
    out_pad = _round_up(out_dim, 128)
    w_out_pad = B * out_pad

    # --- tile / padding selection (tiles never exceed the preferred size) ---
    # Rows of adj (output rows): 8-aligned; prefer >= 2 tiles (v7x megacore).
    n_pad_m = _round_up(N, 8)
    tm_eff = max(8, (min(tm, n_pad_m) // 8) * 8)
    while n_pad_m % tm_eff:
        tm_eff -= 8
    if n_pad_m // tm_eff < 2 and n_pad_m >= 16:
        tm_eff = _round_up(pl.cdiv(N, 2), 8)
        n_pad_m = 2 * tm_eff
    # Columns of adj / rows of v (reduction axis): 128-aligned.
    n_pad_k = _round_up(N, 128)
    tk_eff = max(128, (min(tk, n_pad_k) // 128) * 128)
    while n_pad_k % tk_eff:
        tk_eff -= 128

    # --- wrapper-side layout plumbing (zero padding + batch lane-stacking) --
    adj_p = jnp.zeros((n_pad_m, n_pad_k), adj.dtype).at[:N, :N].set(adj)
    v = jnp.transpose(x, (1, 0, 2)).reshape(N, w_in).astype(compute_dtype)
    v = jnp.zeros((n_pad_k, w_in), compute_dtype).at[:N, :].set(v)
    theta_p = jnp.zeros((in_dim, out_pad), compute_dtype).at[:, :out_dim].set(
        theta.astype(compute_dtype))

    grid = (n_pad_m // tm_eff, n_pad_k // tk_eff)

    kernel = functools.partial(
        _gcn_kernel_tiled, tk=tk_eff, n_batch=B, in_dim=in_dim,
        out_pad=out_pad, compute_dtype=compute_dtype)

    cost = pl.CostEstimate(
        flops=2 * n_pad_m * n_pad_k * w_in
              + 2 * B * n_pad_m * in_dim * out_pad,
        transcendentals=0,
        bytes_accessed=(adj_p.size * adj_p.dtype.itemsize
                        + v.size * v.dtype.itemsize
                        + theta_p.size * theta_p.dtype.itemsize
                        + n_pad_m * w_out_pad * x.dtype.itemsize),
    )

    out_stacked = pl.pallas_call(
        kernel,
        out_shape=jax.ShapeDtypeStruct((n_pad_m, w_out_pad), x.dtype),
        grid_spec=pltpu.PrefetchScalarGridSpec(
            num_scalar_prefetch=0,
            grid=grid,                                  # (row tiles, K tiles)
            in_specs=[
                # adj: streamed f32 tile, cast in-kernel (no wrapper cast pass)
                pl.BlockSpec((tm_eff, tk_eff), lambda i, k: (i, k)),
                # stacked features: whole slab, constant index_map -> one DMA
                pl.BlockSpec((n_pad_k, w_in), lambda i, k: (0, 0)),
                # padded theta: tiny, constant
                pl.BlockSpec((in_dim, out_pad), lambda i, k: (0, 0)),
            ],
            out_specs=pl.BlockSpec((tm_eff, w_out_pad), lambda i, k: (i, 0)),
            scratch_shapes=[pltpu.VMEM((tm_eff, w_in), jnp.float32)],
        ),
        compiler_params=pltpu.CompilerParams(
            dimension_semantics=("parallel", "arbitrary"),
            vmem_limit_bytes=vmem_limit_bytes),
        cost_estimate=cost,
    )(adj_p, v, theta_p)

    # Un-stack / un-pad: (n_pad_m, B*out_pad) -> (B, N, out_dim).
    out = out_stacked[:N].reshape(N, B, out_pad)
    return jnp.transpose(out, (1, 0, 2))[:, :, :out_dim]


# ---------------------------------------------------------------------------
# Public entry point.
# ---------------------------------------------------------------------------
@functools.partial(jax.jit, static_argnames=("tm", "tk", "compute_dtype",
                                              "path", "vmem_limit_bytes"))
def gcn_layer(x, adj, theta, *, tm=512, tk=2048,
              compute_dtype=jnp.bfloat16, path="auto",
              vmem_limit_bytes=32 * 1024 * 1024):
    """Pallas GCN layer: relu(adj @ (x @ theta)) == relu((adj @ x) @ theta)."""
    B, N, in_dim = x.shape
    out_dim = theta.shape[1]
    if path == "auto":
        # Whole-problem f32 footprint; single-shot kernel when it is small.
        small_bytes = 4 * (N * N + B * N * (in_dim + out_dim)
                           + in_dim * out_dim)
        path = "small" if small_bytes <= (4 << 20) else "tiled"
    if path == "small":
        return _gcn_small(x, adj, theta)
    return _gcn_tiled(x, adj, theta, tm=tm, tk=tk,
                      compute_dtype=compute_dtype,
                      vmem_limit_bytes=vmem_limit_bytes)


def gcn_reference(x, adj, theta):
    """Pure-JAX reference mirroring the PyTorch forward."""
    xw = jnp.matmul(x, theta)              # (B, N, out_dim)
    h = jnp.matmul(adj, xw)                # broadcast: (N,N) @ (B,N,out_dim)
    return jax.nn.relu(h)


if __name__ == "__main__":
    key = jax.random.PRNGKey(0)
    kx, kadj, kth, kx2, kadj2 = jax.random.split(key, 5)

    # --- module's own shapes (batch=2, num_of_nodes=16, in=8, out=32):
    #     auto-dispatches to the single-shot small-path kernel (pure f32).
    B, N, in_dim, out_dim = 2, 16, 8, 32
    x = jax.random.normal(kx, (B, N, in_dim), dtype=jnp.float32)
    adj_raw = jax.random.uniform(kadj, (N, N), dtype=jnp.float32)
    adj = adj_raw / jnp.sum(adj_raw, axis=-1, keepdims=True)
    # theta init matches torch.rand(in_dim, out_dim): uniform [0, 1).
    theta = jax.random.uniform(kth, (in_dim, out_dim), dtype=jnp.float32)

    out_small = jax.block_until_ready(gcn_layer(x, adj, theta))
    ref_small = gcn_reference(x, adj, theta)
    assert out_small.shape == (B, N, out_dim)
    assert jnp.allclose(out_small, ref_small, atol=1e-4, rtol=1e-4), (
        "small-path mismatch, max abs diff = "
        f"{jnp.max(jnp.abs(out_small - ref_small))}")

    # --- larger, non-aligned N to exercise the tiled path (row/col padding,
    #     K-accumulator, per-batch finalize, lane-dense padded output).
    N2 = 300
    x2 = jax.random.normal(kx2, (B, N2, in_dim), dtype=jnp.float32)
    adj2_raw = jax.random.uniform(kadj2, (N2, N2), dtype=jnp.float32)
    adj2 = adj2_raw / jnp.sum(adj2_raw, axis=-1, keepdims=True)

    out_tiled = jax.block_until_ready(gcn_layer(x2, adj2, theta, path="tiled"))
    ref_tiled = gcn_reference(x2, adj2, theta)
    assert out_tiled.shape == (B, N2, out_dim)
    # bf16 MXU inputs with f32 accumulation -> tolerance-based comparison.
    assert jnp.allclose(out_tiled, ref_tiled, atol=5e-2, rtol=5e-2), (
        "tiled-path mismatch, max abs diff = "
        f"{jnp.max(jnp.abs(out_tiled - ref_tiled))}")

    print("KERNEL_OK")
</pallas_src>

<mosaic_0001>
module attributes {stable_mosaic.version = 11 : i64} {
  func.func @_gcn_kernel_small(%arg0: memref<2x16x8xf32, #tpu.memory_space<vmem>>, %arg1: memref<16x16xf32, #tpu.memory_space<vmem>>, %arg2: memref<8x32xf32, #tpu.memory_space<vmem>>, %arg3: memref<2x16x32xf32, #tpu.memory_space<vmem>>) attributes {dimension_semantics = [], scalar_prefetch = 0 : i64, scratch_operands = 0 : i64, tpu.core_type = #tpu.core_type<tc>} {
    %c0 = arith.constant 0 : index
    %c0_0 = arith.constant 0 : index
    %0 = vector.load %arg1[%c0, %c0_0] : memref<16x16xf32, #tpu.memory_space<vmem>>, vector<16x16xf32>
    %c0_1 = arith.constant 0 : index
    %c0_2 = arith.constant 0 : index
    %1 = vector.load %arg2[%c0_1, %c0_2] : memref<8x32xf32, #tpu.memory_space<vmem>>, vector<8x32xf32>
    %c0_3 = arith.constant 0 : index
    %c0_4 = arith.constant 0 : index
    %c0_5 = arith.constant 0 : index
    %2 = vector.load %arg0[%c0_3, %c0_4, %c0_5] : memref<2x16x8xf32, #tpu.memory_space<vmem>>, vector<1x16x8xf32>
    %3 = vector.shape_cast %2 : vector<1x16x8xf32> to vector<16x8xf32>
    %cst = arith.constant dense<0.000000e+00> : vector<16x32xf32>
    %4 = tpu.matmul %3, %1, %cst {dimension_numbers = #tpu.dot_dimension_numbers<[1], [0], [0], [1], [0, 0, 1, 1], [], []>} : vector<16x8xf32>, vector<8x32xf32>, vector<16x32xf32> -> vector<16x32xf32>
    %cst_6 = arith.constant dense<0.000000e+00> : vector<16x32xf32>
    %5 = tpu.matmul %0, %4, %cst_6 {dimension_numbers = #tpu.dot_dimension_numbers<[1], [0], [0], [1], [0, 0, 1, 1], [], []>} : vector<16x16xf32>, vector<16x32xf32>, vector<16x32xf32> -> vector<16x32xf32>
    %cst_7 = arith.constant 0.000000e+00 : f32
    %6 = vector.broadcast %cst_7 : f32 to vector<16x32xf32>
    %7 = arith.maximumf %5, %6 : vector<16x32xf32>
    %c0_8 = arith.constant 0 : index
    %c0_9 = arith.constant 0 : index
    %c0_10 = arith.constant 0 : index
    %8 = vector.load %arg3[%c0_8, %c0_9, %c0_10] : memref<2x16x32xf32, #tpu.memory_space<vmem>>, vector<1x16x32xf32>
    %9 = vector.shape_cast %8 : vector<1x16x32xf32> to vector<16x32xf32>
    %10 = vector.shape_cast %7 : vector<16x32xf32> to vector<1x16x32xf32>
    tpu.vector_store %arg3[%c0_8, %c0_9, %c0_10], %10 {strides = array<i32>} : memref<2x16x32xf32, #tpu.memory_space<vmem>>, vector<1x16x32xf32>,
    %c1 = arith.constant 1 : index
    %c0_11 = arith.constant 0 : index
    %c0_12 = arith.constant 0 : index
    %11 = vector.load %arg0[%c1, %c0_11, %c0_12] : memref<2x16x8xf32, #tpu.memory_space<vmem>>, vector<1x16x8xf32>
    %12 = vector.shape_cast %11 : vector<1x16x8xf32> to vector<16x8xf32>
    %cst_13 = arith.constant dense<0.000000e+00> : vector<16x32xf32>
    %13 = tpu.matmul %12, %1, %cst_13 {dimension_numbers = #tpu.dot_dimension_numbers<[1], [0], [0], [1], [0, 0, 1, 1], [], []>} : vector<16x8xf32>, vector<8x32xf32>, vector<16x32xf32> -> vector<16x32xf32>
    %cst_14 = arith.constant dense<0.000000e+00> : vector<16x32xf32>
    %14 = tpu.matmul %0, %13, %cst_14 {dimension_numbers = #tpu.dot_dimension_numbers<[1], [0], [0], [1], [0, 0, 1, 1], [], []>} : vector<16x16xf32>, vector<16x32xf32>, vector<16x32xf32> -> vector<16x32xf32>
    %cst_15 = arith.constant 0.000000e+00 : f32
    %15 = vector.broadcast %cst_15 : f32 to vector<16x32xf32>
    %16 = arith.maximumf %14, %15 : vector<16x32xf32>
    %c1_16 = arith.constant 1 : index
    %c0_17 = arith.constant 0 : index
    %c0_18 = arith.constant 0 : index
    %17 = vector.load %arg3[%c1_16, %c0_17, %c0_18] : memref<2x16x32xf32, #tpu.memory_space<vmem>>, vector<1x16x32xf32>
    %18 = vector.shape_cast %17 : vector<1x16x32xf32> to vector<16x32xf32>
    %19 = vector.shape_cast %16 : vector<16x32xf32> to vector<1x16x32xf32>
    tpu.vector_store %arg3[%c1_16, %c0_17, %c0_18], %19 {strides = array<i32>} : memref<2x16x32xf32, #tpu.memory_space<vmem>>, vector<1x16x32xf32>,
    return
  }
}

</mosaic_0001>

<bundles_post_ra>
// kernel: gcn_layer.1
= control target key start
LH: loop header
LB: loop body
LE: loop exit
PB: predicated region body
PF: predicated region fallthrough
CT: control target
= control target key end

     0   :  { %vm20_vm0 = vcmask 64512   ;;  %s253_s0 = inlined_call_operand.vmem [shape: f32[2,16,8], index: 0, kind: input, shape index: {}]   ;;  %s254_s1 = inlined_call_operand.vmem [shape: f32[16,16], index: 1, kind: input, shape index: {}]   ;;  %s255_s2 = inlined_call_operand.vmem [shape: f32[8,32], index: 2, kind: input, shape index: {}]   ;;  %s256_s3 = inlined_call_operand.hbm [shape: f32[2,16,32], index: 3, kind: output, shape index: {}]  }
   0x1   :  { %v17_v0 = vld [vmem:[%s255_s2] sm:$0xff]  ;;  %v167_v1 = vld [vmem:[%s253_s0 + $0x10] sm:$0xff] }
   0x2   :  { %v18_v2 = vld [vmem:[%s253_s0] sm:$0xff]  ;;  %109 = vmatpush.msra.mxu2 %v17_v0  ;;  %42 = vmatpush.msra.mxu0 %v17_v0 }
   0x3   :  { %8 = vsyncpa [#allocation3], 0  ;;  %169 = vmatmul.msk.f32.vlgmr.msra.gmra.mxu2 %vm20_vm0, %v167_v1  ;;  %163 = vmatmul.msk.f32.vlgmr.msra.gmra.mxu0 %vm20_vm0, %v18_v2  ;;  %v168_v3 = vld [vmem:[%s253_s0 + $0x18] sm:$0xff]  ;;  %v19_v4 = vld [vmem:[%s253_s0 + $0x8] sm:$0xff]  ;;  %vm50_vm1 = vcmask 130048   ;;  %vm82_vm2 = vcmask 261120  }
   0x4   :  { %v15_v8 = vld [vmem:[%s254_s1] sm:$0xff]  ;;  %v16_v10 = vld [vmem:[%s254_s1 + $0x8] sm:$0xff]  ;;  %s202_s0 = smov [#allocation2]   ;;  %s151_s1 = sshll.u32 %s256_s3, 4  ;;  %s152_s1 = int_to_ptr.hbm [resolvable:$true] %s151_s1 }
   0x5   :  { %s149_s25 = sshll.u32 %s202_s0, 4  ;;  %s203_s28 = smov 128   ;;  %s150_s25 = int_to_ptr.vmem [resolvable:$true] %s149_s25 }
   0x6   :  { %s204_s29 = smov 8  }
   0xb   :  { %170 = vmatmul.msk.f32.gmra.mxu2 %vm20_vm0, %v168_v3  ;;  %164 = vmatmul.msk.f32.gmra.mxu0 %vm20_vm0, %v19_v4 }
  0x80   :  { %v44_v5 = vpop.f32.mrf.mxu0 }
  0x86   :  { %v111_v6 = vpop.f32.mrf.mxu2 }
  0x88   :  { %v47_v7 = vpop.f32.mrf.mxu0 }
  0x89   :  { %71 = vmatpush.msra.mxu1 %v47_v7 }
  0x8b   :  { %72 = vmatpush.msra.mxu1 %v44_v5 }
  0x8c   :  { %165 = vmatmul.msk.f32.vlgmr.msra.gmra.mxu1 %vm50_vm1, %v15_v8 }
  0x8e   :  { %v114_v9 = vpop.f32.mrf.mxu2 }
  0x8f   :  { %131 = vmatpush.msra.mxu3 %v114_v9 }
  0x91   :  { %132 = vmatpush.msra.mxu3 %v111_v6 }
  0x92   :  { %171 = vmatmul.msk.f32.vlgmr.msra.gmra.mxu3 %vm50_vm1, %v15_v8 }
  0x94   :  { %166 = vmatmul.msk.f32.gmra.mxu1 %vm50_vm1, %v16_v10 }
  0x9a   :  { %172 = vmatmul.msk.f32.gmra.mxu3 %vm50_vm1, %v16_v10 }
 0x109   :  { %v74_v11 = vpop.f32.mrf.mxu1 }
 0x10a   :  { %v80_v12 = vmax.f32 %v74_v11, 0.0 }
 0x10c   :  { %83 = vst.msk [vmem:[#allocation2] sm:$0xff] %vm82_vm2, %v80_v12 }
 0x111   :  { %v77_v13 = vpop.f32.mrf.mxu1 }
 0x112   :  { %v81_v14 = vmax.f32 %v77_v13, 0.0 }
 0x114   :  { %84 = vst.msk [vmem:[#allocation2 + $0x8] sm:$0xff] %vm82_vm2, %v81_v14 }
 0x115   :  { %v134_v15 = vpop.f32.mrf.mxu3 }
 0x116   :  { %v140_v16 = vmax.f32 %v134_v15, 0.0 }
 0x118   :  { %143 = vst.msk [vmem:[#allocation2 + $0x10] sm:$0xff] %vm82_vm2, %v140_v16 }
 0x11d   :  { %v137_v17 = vpop.f32.mrf.mxu3 }
 0x11e   :  { %v141_v18 = vmax.f32 %v137_v17, 0.0 }
 0x120   :  { %144 = vst.msk [vmem:[#allocation2 + $0x18] sm:$0xff] %vm82_vm2, %v141_v18 }
 0x121   :  { %157 = dma.vmem_to_hbm [thread:$0]  %s150_s25, 512, %s152_s1, [#allocation3], %s203_s28, %s203_s28, %s204_s29  }
 0x122   :  { %200 = dma.done.wait [#allocation3], 512  }
 0x123   :  { %201 = vsyncadd [#allocation3], 4294966784 }
 0x124   :  { %162 = vsyncpa [#allocation3], 1 }

</bundles_post_ra>
